<compile_context>
chip_gen: v7x
topology: tpu7x:2x2x1
jax: 0.10.0
libtpu: 0.0.40
codegen_flags: <defaults>
</compile_context>

<pallas_src>
import math
import functools

import jax
import jax.numpy as jnp
from jax.experimental import pallas as pl
from jax.experimental.pallas import tpu as pltpu


# ---------------------------------------------------------------------------
# Hardware limits (per-TensorCore VMEM, TensorCores per chip)
# ---------------------------------------------------------------------------
def _tpu_vmem_and_cores():
    vmem_cap, n_cores = 128 << 20, 0
    try:
        info = pltpu.get_tpu_info()
        vmem_cap = int(getattr(info, "vmem_capacity_bytes", vmem_cap))
        n_cores = int(getattr(info, "num_cores", 0) or 0)
    except Exception:
        pass
    if n_cores <= 0:
        # v7x heuristic: 64 MiB VMEM per TC, 2 TCs/chip; v5e/v6e: 128 MiB, 1 TC.
        n_cores = 2 if vmem_cap <= (64 << 20) else 1
    return vmem_cap, n_cores


# ---------------------------------------------------------------------------
# Fused kernel: L x (Mlp -> GELU -> Mlp -> RotateChord -> residual) + mean-pool
# ---------------------------------------------------------------------------
def make_fused_kernel(*, n_tracks, track_size, batch_tile, seq_len, emb,
                      hidden, matmul_dtype):
    Bt, S, E, H, ts = batch_tile, seq_len, emb, hidden, track_size

    def kernel(x_hbm, w1_ref, b1_ref, w2_ref, b2_ref, o_ref, act_ref, in_sem):
        b = pl.program_id(0)
        l = pl.program_id(1)

        # First layer step of each batch tile: DMA the tile straight from HBM
        # into the resident f32 activation scratch (no pipelined input block,
        # no VMEM->VMEM copy).
        @pl.when(l == 0)
        def _():
            cp = pltpu.make_async_copy(
                x_hbm.at[pl.ds(b * Bt, Bt)], act_ref, in_sem.at[0])
            cp.start()
            cp.wait()

        x3 = act_ref[...]                      # (Bt, S, E) f32 residual input
        x2 = x3.reshape(Bt * S, E)             # fold batch into the MXU M dim
                                               # (S % 8 == 0 -> free relayout)

        # Layer-l slices of the VMEM-resident weight stack.
        w1 = w1_ref[l]                         # (E, H) matmul dtype (bf16)
        w2 = w2_ref[l]                         # (H, E)
        b1 = b1_ref[l]                         # (1, H) f32
        b2 = b2_ref[l]                         # (1, E) f32

        # Mlp: fc1 -> GELU (tanh approx -> EUP) -> fc2, f32 accumulation.
        h = jnp.dot(x2.astype(matmul_dtype), w1,
                    preferred_element_type=jnp.float32) + b1
        h = jax.nn.gelu(h, approximate=True)   # torch default is exact erf;
                                               # tanh chosen per perf review
        y2 = jnp.dot(h.astype(matmul_dtype), w2,
                     preferred_element_type=jnp.float32) + b2
        y3 = y2.reshape(Bt, S, E)

        # RotateChord: track i (i >= 1) rolled along the sequence axis by
        # -2**(i-1) (same semantics as torch.roll with shifts=-2**(i-1));
        # track 0 untouched.  Full-lane-width rolls (XLU) + lane-mask selects
        # (VPU) instead of narrow lane slices + concat.
        lane = jax.lax.broadcasted_iota(jnp.int32, (Bt, S, E), 2)
        z = y3
        for i in range(1, n_tracks):
            shift = (2 ** (i - 1)) % S
            rolled = jnp.roll(y3, -shift, axis=1) if shift else y3
            mask = (lane >= i * ts) & (lane < (i + 1) * ts)
            z = jnp.where(mask, rolled, z)

        # Residual add; running activation stays resident in VMEM.
        act_ref[...] = z + x3

        # Last layer: fuse the mean-pool over the sequence dimension.
        @pl.when(l == pl.num_programs(1) - 1)
        def _():
            o_ref[...] = jnp.mean(act_ref[...], axis=1).astype(o_ref.dtype)

    return kernel


# ---------------------------------------------------------------------------
# VMEM accounting / tile selection
# ---------------------------------------------------------------------------
def _fused_vmem_bytes(Bt, S, E, H, L, w_itemsize):
    act = Bt * S * E * 4                                 # resident activation
    weights = 2 * L * (E * H + H * E) * w_itemsize       # (double-buffered) stacks
    biases = 2 * L * (H + E) * 4
    out = 2 * Bt * E * 4                                 # pooled output block
    # live per-layer temporaries: hidden h (Bt*S*H), y2/y3, rolled copy,
    # select result, lane iota (i32)
    temps = Bt * S * (H + 4 * E) * 4
    internal = 1 << 20                                   # compiler scratch slack
    return act + weights + biases + out + temps + internal


def _pick_batch_tile(B, S, E, H, L, w_itemsize, *, budget, min_tiles=1):
    candidates = [bt for bt in range(B, 0, -1) if B % bt == 0]

    def ok(bt, need_tiles, need_align):
        if need_tiles and (B // bt) < min_tiles:
            return False
        if need_align and (bt * S) % 8 != 0:
            return False
        return _fused_vmem_bytes(bt, S, E, H, L, w_itemsize) <= budget

    # Prefer: enough tiles for all TensorCores AND Bt*S % 8 == 0; relax in order.
    for need_tiles, need_align in ((True, True), (True, False),
                                   (False, True), (False, False)):
        for bt in candidates:
            if ok(bt, need_tiles, need_align):
                return bt
    return 1


# ---------------------------------------------------------------------------
# All ChordMixer blocks + sequence mean-pool in one pallas_call
# ---------------------------------------------------------------------------
def chordmixer_blocks_fused(x, w1_all, b1_all, w2_all, b2_all, *,
                            n_tracks, track_size, batch_tile=None,
                            matmul_dtype=jnp.bfloat16):
    """x: [B, S, E] f32; w1_all: [L,E,H]; b1_all: [L,1,H]; w2_all: [L,H,E];
    b2_all: [L,1,E].  Returns pooled [B, E] (mean over sequence)."""
    x = x.astype(jnp.float32)
    B, S, E = x.shape
    L, _, H = w1_all.shape

    # Cast weights once outside the kernel (bf16 halves HBM/VMEM weight bytes
    # and feeds the MXU natively); biases stay f32 (added after f32 accum).
    w1c = w1_all.astype(matmul_dtype)
    w2c = w2_all.astype(matmul_dtype)
    b1c = b1_all.astype(jnp.float32)
    b2c = b2_all.astype(jnp.float32)
    w_itemsize = jnp.dtype(matmul_dtype).itemsize

    vmem_cap, n_cores = _tpu_vmem_and_cores()
    # v7x (64 MiB/TC): ~28 MiB tile budget; v5e/v6e (128 MiB): ~90 MiB.
    budget = int(0.45 * vmem_cap) if vmem_cap <= (64 << 20) else int(0.70 * vmem_cap)

    Bt = batch_tile or _pick_batch_tile(B, S, E, H, L, w_itemsize,
                                        budget=budget, min_tiles=n_cores)
    assert B % Bt == 0, "batch_tile must divide the batch size"

    need = _fused_vmem_bytes(Bt, S, E, H, L, w_itemsize)
    vmem_limit = int(min(max(need + (4 << 20), 16 << 20), vmem_cap - (8 << 20)))

    kernel = make_fused_kernel(
        n_tracks=n_tracks, track_size=track_size, batch_tile=Bt,
        seq_len=S, emb=E, hidden=H, matmul_dtype=matmul_dtype)

    # TODO(synk): for very long sequences, tile the MLP over S and implement
    # RotateChord via wrap-split offset-DMA writes so the resident footprint
    # is independent of S.
    return pl.pallas_call(
        kernel,
        out_shape=jax.ShapeDtypeStruct((B, E), jnp.float32),
        grid=(B // Bt, L),
        in_specs=[
            # Activations stay in HBM; DMA'd manually into the resident scratch.
            pl.BlockSpec(memory_space=pl.ANY),
            # Whole weight stacks VMEM-resident (constant index map -> one DMA).
            pl.BlockSpec((L, E, H), lambda b, l: (0, 0, 0)),   # fc1 weights
            pl.BlockSpec((L, 1, H), lambda b, l: (0, 0, 0)),   # fc1 biases
            pl.BlockSpec((L, H, E), lambda b, l: (0, 0, 0)),   # fc2 weights
            pl.BlockSpec((L, 1, E), lambda b, l: (0, 0, 0)),   # fc2 biases
        ],
        out_specs=pl.BlockSpec((Bt, E), lambda b, l: (b, 0)),
        scratch_shapes=[
            pltpu.VMEM((Bt, S, E), jnp.float32),   # resident activation
            pltpu.SemaphoreType.DMA((1,)),         # input-tile DMA semaphore
        ],
        compiler_params=pltpu.CompilerParams(
            dimension_semantics=("parallel", "arbitrary"),
            vmem_limit_bytes=vmem_limit),
    )(x, w1c, b1c, w2c, b2c)


# ---------------------------------------------------------------------------
# Parameter init (deterministic) + full forward
# ---------------------------------------------------------------------------
def init_params(key, *, max_seq_len, track_size, hidden_size, n_class):
    n_tracks = math.ceil(math.log2(max_seq_len))     # == max_n_layers
    E = n_tracks * track_size
    L = n_tracks
    H = hidden_size

    keys = jax.random.split(key, 9)

    def lin(k, fan_in, shape):
        return (jax.random.uniform(k, shape, jnp.float32, -1.0, 1.0)
                / jnp.sqrt(jnp.float32(fan_in)))

    params = {
        # embedding_type == 'dense' path: nn.Linear(1, E)
        "w_emb": lin(keys[0], 1, (E,)),
        "b_emb": lin(keys[1], 1, (E,)),
        # positional embedding table
        "pos_emb": jax.random.normal(keys[2], (max_seq_len, E), jnp.float32) * 0.02,
        # final classifier
        "wf": lin(keys[3], E, (E, n_class)),
        "bf": lin(keys[4], E, (n_class,)),
        # stacked per-layer ChordMixerBlock weights
        "w1_all": lin(keys[5], E, (L, E, H)),
        "b1_all": lin(keys[6], E, (L, 1, H)),
        "w2_all": lin(keys[7], H, (L, H, E)),
        "b2_all": lin(keys[8], H, (L, 1, E)),
    }
    return params, n_tracks, E


def chordmixer_forward(params, data, *, n_tracks, track_size,
                       matmul_dtype=jnp.bfloat16):
    # data: float [B, S]  ('dense' embedding: x.unsqueeze(-1) -> Linear(1, E)).
    x = (data[..., None] * params["w_emb"][None, None, :]
         + params["b_emb"][None, None, :])
    # positional embedding (positions = arange(max_seq_len); S == max_seq_len)
    x = x + params["pos_emb"][None, :, :]
    # All L blocks + sequence mean-pool in one fused Pallas kernel.
    pooled = chordmixer_blocks_fused(
        x, params["w1_all"], params["b1_all"], params["w2_all"],
        params["b2_all"], n_tracks=n_tracks, track_size=track_size,
        matmul_dtype=matmul_dtype)
    # Final Linear(E, n_class): tiny, lane-sparse output -> plain XLA.
    return pooled @ params["wf"] + params["bf"]


if __name__ == "__main__":
    # Small, shape-consistent, MXU-friendly config:
    #   max_seq_len = 16  ->  n_tracks = n_layers = 4
    #   track_size  = 32  ->  embedding_size = 128  (lane-aligned)
    #   hidden_size = 128                           (lane-aligned)
    max_seq_len = 16
    track_size = 32
    hidden_size = 128
    n_class = 4
    batch = 2

    key = jax.random.PRNGKey(0)
    pkey, dkey = jax.random.split(key)
    params, n_tracks, E = init_params(
        pkey, max_seq_len=max_seq_len, track_size=track_size,
        hidden_size=hidden_size, n_class=n_class)

    data = jax.random.normal(dkey, (batch, max_seq_len), dtype=jnp.float32)

    fwd = jax.jit(functools.partial(
        chordmixer_forward, n_tracks=n_tracks, track_size=track_size))
    out = fwd(params, data)
    jax.block_until_ready(out)
    assert out.shape == (batch, n_class)
    print("KERNEL_OK")
</pallas_src>

<mosaic_0001>
module attributes {stable_mosaic.version = 11 : i64} {
  func.func @kernel(%arg0: i32, %arg1: i32, %arg2: memref<2x16x128xf32, #tpu.memory_space<any>>, %arg3: memref<4x128x128xbf16, #tpu.memory_space<vmem>>, %arg4: memref<4x1x128xf32, #tpu.memory_space<vmem>>, %arg5: memref<4x128x128xbf16, #tpu.memory_space<vmem>>, %arg6: memref<4x1x128xf32, #tpu.memory_space<vmem>>, %arg7: memref<2x128xf32, #tpu.memory_space<vmem>>, %arg8: memref<2x16x128xf32, #tpu.memory_space<vmem>>, %arg9: memref<1x!tpu.dma_semaphore, #tpu.memory_space<semaphore_mem>>) attributes {dimension_semantics = [#tpu.dimension_semantics<parallel>, #tpu.dimension_semantics<arbitrary>], iteration_bounds = array<i64: 1, 4>, scalar_prefetch = 0 : i64, scratch_operands = 2 : i64, tpu.core_type = #tpu.core_type<tc>, window_params = [{}, {pipeline_mode = #tpu.pipeline_mode<synchronous>, transform_indices = @transform_1, window_bounds = array<i64: 4, 128, 128>}, {pipeline_mode = #tpu.pipeline_mode<synchronous>, transform_indices = @transform_2, window_bounds = array<i64: 4, 1, 128>}, {pipeline_mode = #tpu.pipeline_mode<synchronous>, transform_indices = @transform_3, window_bounds = array<i64: 4, 128, 128>}, {pipeline_mode = #tpu.pipeline_mode<synchronous>, transform_indices = @transform_4, window_bounds = array<i64: 4, 1, 128>}, {transform_indices = @transform_5, window_bounds = array<i64: 2, 128>}]} {
    %c0_i32 = arith.constant 0 : i32
    %0 = arith.cmpi eq, %arg1, %c0_i32 : i32
    %1 = arith.extui %0 : i1 to i32
    %c0_i32_0 = arith.constant 0 : i32
    %2 = arith.cmpi ne, %1, %c0_i32_0 : i32
    scf.if %2 {
      %c2_i32 = arith.constant 2 : i32
      %72 = arith.muli %arg0, %c2_i32 : i32
      %c0_i32_22 = arith.constant 0 : i32
      %c0_i32_23 = arith.constant 0 : i32
      %c0_i32_24 = arith.constant 0 : i32
      %73 = tpu.memref_slice %arg2[%72, %c0_i32_23, %c0_i32_24] : memref<2x16x128xf32, #tpu.memory_space<any>> -> memref<2x16x128xf32, #tpu.memory_space<any>>
      %74 = tpu.memref_slice %arg9[%c0_i32_22] : memref<1x!tpu.dma_semaphore, #tpu.memory_space<semaphore_mem>> -> memref<1x!tpu.dma_semaphore, #tpu.memory_space<semaphore_mem>>
      %75 = tpu.memref_squeeze %74 : memref<1x!tpu.dma_semaphore, #tpu.memory_space<semaphore_mem>> -> memref<!tpu.dma_semaphore, #tpu.memory_space<semaphore_mem>>
      tpu.enqueue_dma source(%73 : memref<2x16x128xf32, #tpu.memory_space<any>>) target(%arg8 : memref<2x16x128xf32, #tpu.memory_space<vmem>>) target_semaphore(%75 : memref<!tpu.dma_semaphore, #tpu.memory_space<semaphore_mem>>)
      %c0_i32_25 = arith.constant 0 : i32
      %c0_i32_26 = arith.constant 0 : i32
      %c0_i32_27 = arith.constant 0 : i32
      %76 = tpu.memref_slice %arg2[%72, %c0_i32_26, %c0_i32_27] : memref<2x16x128xf32, #tpu.memory_space<any>> -> memref<2x16x128xf32, #tpu.memory_space<any>>
      %77 = tpu.memref_slice %arg9[%c0_i32_25] : memref<1x!tpu.dma_semaphore, #tpu.memory_space<semaphore_mem>> -> memref<1x!tpu.dma_semaphore, #tpu.memory_space<semaphore_mem>>
      %78 = tpu.memref_squeeze %77 : memref<1x!tpu.dma_semaphore, #tpu.memory_space<semaphore_mem>> -> memref<!tpu.dma_semaphore, #tpu.memory_space<semaphore_mem>>
      tpu.wait_dma2 semaphore(%78 : memref<!tpu.dma_semaphore, #tpu.memory_space<semaphore_mem>>) src(%76 : memref<2x16x128xf32, #tpu.memory_space<any>>) dst(%arg8 : memref<2x16x128xf32, #tpu.memory_space<vmem>>)
    } else {
    }
    %c0 = arith.constant 0 : index
    %c0_1 = arith.constant 0 : index
    %c0_2 = arith.constant 0 : index
    %3 = vector.load %arg8[%c0, %c0_1, %c0_2] : memref<2x16x128xf32, #tpu.memory_space<vmem>>, vector<2x16x128xf32>
    %4 = vector.shape_cast %3 : vector<2x16x128xf32> to vector<32x128xf32>
    %5 = arith.index_cast %arg1 : i32 to index
    %c0_3 = arith.constant 0 : index
    %c0_4 = arith.constant 0 : index
    %6 = vector.load %arg3[%5, %c0_3, %c0_4] : memref<4x128x128xbf16, #tpu.memory_space<vmem>>, vector<1x128x128xbf16>
    %7 = vector.shape_cast %6 : vector<1x128x128xbf16> to vector<128x128xbf16>
    %8 = arith.index_cast %arg1 : i32 to index
    %c0_5 = arith.constant 0 : index
    %c0_6 = arith.constant 0 : index
    %9 = vector.load %arg5[%8, %c0_5, %c0_6] : memref<4x128x128xbf16, #tpu.memory_space<vmem>>, vector<1x128x128xbf16>
    %10 = vector.shape_cast %9 : vector<1x128x128xbf16> to vector<128x128xbf16>
    %11 = arith.index_cast %arg1 : i32 to index
    %c0_7 = arith.constant 0 : index
    %c0_8 = arith.constant 0 : index
    %12 = vector.load %arg4[%11, %c0_7, %c0_8] : memref<4x1x128xf32, #tpu.memory_space<vmem>>, vector<1x1x128xf32>
    %13 = vector.shape_cast %12 : vector<1x1x128xf32> to vector<1x128xf32>
    %14 = arith.index_cast %arg1 : i32 to index
    %c0_9 = arith.constant 0 : index
    %c0_10 = arith.constant 0 : index
    %15 = vector.load %arg6[%14, %c0_9, %c0_10] : memref<4x1x128xf32, #tpu.memory_space<vmem>>, vector<1x1x128xf32>
    %16 = vector.shape_cast %15 : vector<1x1x128xf32> to vector<1x128xf32>
    %17 = arith.truncf %4 : vector<32x128xf32> to vector<32x128xbf16>
    %cst = arith.constant dense<0.000000e+00> : vector<32x128xf32>
    %18 = tpu.matmul %17, %7, %cst {dimension_numbers = #tpu.dot_dimension_numbers<[1], [0], [0], [1], [0, 0, 1, 1], [], []>} : vector<32x128xbf16>, vector<128x128xbf16>, vector<32x128xf32> -> vector<32x128xf32>
    %19 = vector.broadcast %13 : vector<1x128xf32> to vector<32x128xf32>
    %20 = arith.addf %18, %19 : vector<32x128xf32>
    %21 = arith.mulf %20, %20 : vector<32x128xf32>
    %22 = arith.mulf %20, %21 : vector<32x128xf32>
    %cst_11 = arith.constant 4.471500e-02 : f32
    %23 = vector.broadcast %cst_11 : f32 to vector<32x128xf32>
    %24 = arith.mulf %23, %22 : vector<32x128xf32>
    %25 = arith.addf %20, %24 : vector<32x128xf32>
    %cst_12 = arith.constant 0.797884583 : f32
    %26 = vector.broadcast %cst_12 : f32 to vector<32x128xf32>
    %27 = arith.mulf %26, %25 : vector<32x128xf32>
    %28 = math.tanh %27 : vector<32x128xf32>
    %cst_13 = arith.constant 1.000000e+00 : f32
    %29 = vector.broadcast %cst_13 : f32 to vector<32x128xf32>
    %30 = arith.addf %29, %28 : vector<32x128xf32>
    %cst_14 = arith.constant 5.000000e-01 : f32
    %31 = vector.broadcast %cst_14 : f32 to vector<32x128xf32>
    %32 = arith.mulf %31, %30 : vector<32x128xf32>
    %33 = arith.mulf %20, %32 : vector<32x128xf32>
    %34 = arith.truncf %33 : vector<32x128xf32> to vector<32x128xbf16>
    %cst_15 = arith.constant dense<0.000000e+00> : vector<32x128xf32>
    %35 = tpu.matmul %34, %10, %cst_15 {dimension_numbers = #tpu.dot_dimension_numbers<[1], [0], [0], [1], [0, 0, 1, 1], [], []>} : vector<32x128xbf16>, vector<128x128xbf16>, vector<32x128xf32> -> vector<32x128xf32>
    %36 = vector.broadcast %16 : vector<1x128xf32> to vector<32x128xf32>
    %37 = arith.addf %35, %36 : vector<32x128xf32>
    %38 = vector.shape_cast %37 : vector<32x128xf32> to vector<2x16x128xf32>
    %39 = tpu.iota {dimensions = array<i32: 2>} : vector<2x16x128xi32>
    %40 = vector.extract_strided_slice %38 {offsets = [0, 1, 0], sizes = [2, 15, 128], strides = [1, 1, 1]} : vector<2x16x128xf32> to vector<2x15x128xf32>
    %41 = vector.extract_strided_slice %38 {offsets = [0, 0, 0], sizes = [2, 1, 128], strides = [1, 1, 1]} : vector<2x16x128xf32> to vector<2x1x128xf32>
    %42 = tpu.concatenate %40, %41 in 1 : vector<2x15x128xf32>, vector<2x1x128xf32> -> vector<2x16x128xf32>
    %c32_i32 = arith.constant 32 : i32
    %43 = vector.broadcast %c32_i32 : i32 to vector<2x16x128xi32>
    %44 = arith.cmpi sge, %39, %43 : vector<2x16x128xi32>
    %c64_i32 = arith.constant 64 : i32
    %45 = vector.broadcast %c64_i32 : i32 to vector<2x16x128xi32>
    %46 = arith.cmpi slt, %39, %45 : vector<2x16x128xi32>
    %47 = arith.andi %44, %46 : vector<2x16x128xi1>
    %48 = arith.select %47, %42, %38 : vector<2x16x128xi1>, vector<2x16x128xf32>
    %49 = vector.extract_strided_slice %38 {offsets = [0, 2, 0], sizes = [2, 14, 128], strides = [1, 1, 1]} : vector<2x16x128xf32> to vector<2x14x128xf32>
    %50 = vector.extract_strided_slice %38 {offsets = [0, 0, 0], sizes = [2, 2, 128], strides = [1, 1, 1]} : vector<2x16x128xf32> to vector<2x2x128xf32>
    %51 = tpu.concatenate %49, %50 in 1 : vector<2x14x128xf32>, vector<2x2x128xf32> -> vector<2x16x128xf32>
    %c64_i32_16 = arith.constant 64 : i32
    %52 = vector.broadcast %c64_i32_16 : i32 to vector<2x16x128xi32>
    %53 = arith.cmpi sge, %39, %52 : vector<2x16x128xi32>
    %c96_i32 = arith.constant 96 : i32
    %54 = vector.broadcast %c96_i32 : i32 to vector<2x16x128xi32>
    %55 = arith.cmpi slt, %39, %54 : vector<2x16x128xi32>
    %56 = arith.andi %53, %55 : vector<2x16x128xi1>
    %57 = arith.select %56, %51, %48 : vector<2x16x128xi1>, vector<2x16x128xf32>
    %58 = vector.extract_strided_slice %38 {offsets = [0, 4, 0], sizes = [2, 12, 128], strides = [1, 1, 1]} : vector<2x16x128xf32> to vector<2x12x128xf32>
    %59 = vector.extract_strided_slice %38 {offsets = [0, 0, 0], sizes = [2, 4, 128], strides = [1, 1, 1]} : vector<2x16x128xf32> to vector<2x4x128xf32>
    %60 = tpu.concatenate %58, %59 in 1 : vector<2x12x128xf32>, vector<2x4x128xf32> -> vector<2x16x128xf32>
    %c96_i32_17 = arith.constant 96 : i32
    %61 = vector.broadcast %c96_i32_17 : i32 to vector<2x16x128xi32>
    %62 = arith.cmpi sge, %39, %61 : vector<2x16x128xi32>
    %c128_i32 = arith.constant 128 : i32
    %63 = vector.broadcast %c128_i32 : i32 to vector<2x16x128xi32>
    %64 = arith.cmpi slt, %39, %63 : vector<2x16x128xi32>
    %65 = arith.andi %62, %64 : vector<2x16x128xi1>
    %66 = arith.select %65, %60, %57 : vector<2x16x128xi1>, vector<2x16x128xf32>
    %67 = arith.addf %66, %3 : vector<2x16x128xf32>
    %c0_18 = arith.constant 0 : index
    %c0_19 = arith.constant 0 : index
    %c0_20 = arith.constant 0 : index
    %68 = vector.load %arg8[%c0_18, %c0_19, %c0_20] : memref<2x16x128xf32, #tpu.memory_space<vmem>>, vector<2x16x128xf32>
    tpu.vector_store %arg8[%c0_18, %c0_19, %c0_20], %67 {strides = array<i32>} : memref<2x16x128xf32, #tpu.memory_space<vmem>>, vector<2x16x128xf32>,
    %c3_i32 = arith.constant 3 : i32
    %69 = arith.cmpi eq, %arg1, %c3_i32 : i32
    %70 = arith.extui %69 : i1 to i32
    %c0_i32_21 = arith.constant 0 : i32
    %71 = arith.cmpi ne, %70, %c0_i32_21 : i32
    scf.if %71 {
      %c0_22 = arith.constant 0 : index
      %c0_23 = arith.constant 0 : index
      %c0_24 = arith.constant 0 : index
      %72 = vector.load %arg8[%c0_22, %c0_23, %c0_24] : memref<2x16x128xf32, #tpu.memory_space<vmem>>, vector<2x16x128xf32>
      %cst_25 = arith.constant dense<0.000000e+00> : vector<2x128xf32>
      %73 = vector.multi_reduction <add>, %72, %cst_25 [1] : vector<2x16x128xf32> to vector<2x128xf32>
      %cst_26 = arith.constant 1.600000e+01 : f32
      %74 = vector.broadcast %cst_26 : f32 to vector<2x128xf32>
      %75 = arith.divf %73, %74 : vector<2x128xf32>
      %c0_27 = arith.constant 0 : index
      %c0_28 = arith.constant 0 : index
      %76 = vector.load %arg7[%c0_27, %c0_28] : memref<2x128xf32, #tpu.memory_space<vmem>>, vector<2x128xf32>
      tpu.vector_store %arg7[%c0_27, %c0_28], %75 {strides = array<i32>} : memref<2x128xf32, #tpu.memory_space<vmem>>, vector<2x128xf32>,
    } else {
    }
    return
  }
  func.func @transform_1(%arg0: i32, %arg1: i32) -> (i32, i32, i32) {
    %c0_i32 = arith.constant 0 : i32
    %c0_i32_0 = arith.constant 0 : i32
    %c0_i32_1 = arith.constant 0 : i32
    %c0_i32_2 = arith.constant 0 : i32
    return %c0_i32, %c0_i32_0, %c0_i32_1 : i32, i32, i32
  }
  func.func @transform_2(%arg0: i32, %arg1: i32) -> (i32, i32, i32) {
    %c0_i32 = arith.constant 0 : i32
    %c0_i32_0 = arith.constant 0 : i32
    %c0_i32_1 = arith.constant 0 : i32
    %c0_i32_2 = arith.constant 0 : i32
    return %c0_i32, %c0_i32_0, %c0_i32_1 : i32, i32, i32
  }
  func.func @transform_3(%arg0: i32, %arg1: i32) -> (i32, i32, i32) {
    %c0_i32 = arith.constant 0 : i32
    %c0_i32_0 = arith.constant 0 : i32
    %c0_i32_1 = arith.constant 0 : i32
    %c0_i32_2 = arith.constant 0 : i32
    return %c0_i32, %c0_i32_0, %c0_i32_1 : i32, i32, i32
  }
  func.func @transform_4(%arg0: i32, %arg1: i32) -> (i32, i32, i32) {
    %c0_i32 = arith.constant 0 : i32
    %c0_i32_0 = arith.constant 0 : i32
    %c0_i32_1 = arith.constant 0 : i32
    %c0_i32_2 = arith.constant 0 : i32
    return %c0_i32, %c0_i32_0, %c0_i32_1 : i32, i32, i32
  }
  func.func @transform_5(%arg0: i32, %arg1: i32) -> (i32, i32) {
    %c0_i32 = arith.constant 0 : i32
    %c0_i32_0 = arith.constant 0 : i32
    return %arg0, %c0_i32 : i32, i32
  }
}

</mosaic_0001>

<bundles_post_ra>
// kernel: chordmixer_forward.1
= control target key start
LH: loop header
LB: loop body
LE: loop exit
PB: predicated region body
PF: predicated region fallthrough
CT: control target
= control target key end

     0   :  { %s916_s18 = smov 0   ;;  %s918_s19 = smov 0   ;;  %s1040_s0 = inlined_call_operand.vmem [shape: f32[2,16,128], index: 0, kind: input, shape index: {}]   ;;  %s1041_s1 = inlined_call_operand.vmem [shape: bf16[4,128,128], index: 1, kind: input, shape index: {}]   ;;  %s1042_s2 = inlined_call_operand.vmem [shape: f32[4,1,128], index: 2, kind: input, shape index: {}]   ;;  %s1043_s3 = inlined_call_operand.vmem [shape: bf16[4,128,128], index: 3, kind: input, shape index: {}]   ;;  %s1044_s4 = inlined_call_operand.vmem [shape: f32[4,1,128], index: 4, kind: input, shape index: {}]   ;;  %s1045_s5 = inlined_call_operand.vmem [shape: f32[2,128], index: 5, kind: output, shape index: {}]  }
   0x1   :  { %s920_s20 = smov 0  }
   0x2 LB: > { %s24_s21 = sadd.s32 1, %s880_s19  ;;  %p722_p0 = scmp.ge.s32.totalorder %s884_s20, 1  ;;  %s884_s20 = sphi %s920_s20, %s15_s20   ;;  %s880_s19 = sphi %s918_s19, %s1051_s19   ;;  %s876_s18 = sphi %s916_s18, %s1050_s18  }
   0x3   : > { %p25_p1 = scmp.ge.s32.totalorder %s24_s21, 4  ;;  %p165_p2 = scmp.lt.s32.totalorder %s884_s20, 5 }
   0x5   : > { %s1053_s21 = smov (%p25_p1, %s24_s21), 0  ;;  %p166_p3 = pnand %p722_p0, %p165_p2 }
   0x6   : > { %p723_p4 = scmp.ne.s32.totalorder (!%p166_p3), %s876_s18, 0 }
   0x7   : > { %169 = sbr.rel (%p166_p3) target bundleno = 559 (0x22f), region = 36 }
   0xe   : > { %193 = sbr.rel (%p723_p4) target bundleno = 24 (0x18), region = 40  ;;  %v229_v0 = vld [vmem:[%s1040_s0] sm:$0xff] (!%p723_p4)  ;;  %v231_v1 = vld [vmem:[%s1040_s0 + $0x8] sm:$0xff] (!%p723_p4)  ;;  %v233_v2 = vld [vmem:[%s1040_s0 + $0x10] sm:$0xff] (!%p723_p4) }
   0xf   : > { %230 = vst [vmem:[#allocation2] sm:$0xff] (!%p723_p4), %v229_v0  ;;  %232 = vst [vmem:[#allocation2 + $0x8] sm:$0xff] (!%p723_p4), %v231_v1  ;;  %v235_v3 = vld [vmem:[%s1040_s0 + $0x18] sm:$0xff] (!%p723_p4) }
  0x10   : > { %234 = vst [vmem:[#allocation2 + $0x10] sm:$0xff] (!%p723_p4), %v233_v2  ;;  %236 = vst [vmem:[#allocation2 + $0x18] sm:$0xff] (!%p723_p4), %v235_v3 }
  0x15   : > { %244 = vsyncadd [#allocation3], 512 }
  0x16   : > { %872 = dma.done.wait [#allocation3], 512 }
  0x17   : > { %873 = vsyncadd [#allocation3], 4294966784 }
  0x18 PF: > { %s750_s30 = sshll.u32 %s876_s18, 6  ;;  %s290_s14 = scalar_lea.vmem %s1042_s2, %s876_s18  ;;  %vm546_vm0 = vcmask 1046528   ;;  %vm568_vm3 = vcmask 1045504   ;;  %vm590_vm5 = vcmask 1043456  }
  0x19   : > { %v950_v4 = vld [vmem:[#allocation2] sm:$0xff]  ;;  %v952_v5 = vld [vmem:[#allocation2 + $0x8] sm:$0xff]  ;;  %s255_s8 = scalar_lea.vmem %s1041_s1, %s750_s30  ;;  %s273_s11 = scalar_lea.vmem %s1043_s3, %s750_s30 }
  0x1a   : > { %v294_v6 = vpack.c.bf16 %v952_v5, %v950_v4  ;;  %v836_v7 = vld [vmem:[%s255_s8] sm:$0xff]   ;;  %v837_v8 = vld [vmem:[%s255_s8 + $0x8] sm:$0xff]   ;;  %v838_v9 = vld [vmem:[%s255_s8 + $0x10] sm:$0xff]   ;;  %s292_s17 = scalar_lea.vmem %s1044_s4, %s876_s18  ;;  %p745_p5 = scmp.ne.s32.totalorder %s876_s18, 3 }
  0x1b   : > { %772 = vmatprep.subr.bf16.mxu0 %v836_v7  ;;  %v839_v10 = vld [vmem:[%s255_s8 + $0x18] sm:$0xff]   ;;  %v840_v11 = vld [vmem:[%s255_s8 + $0x20] sm:$0xff]   ;;  %v841_v12 = vld [vmem:[%s255_s8 + $0x28] sm:$0xff]   ;;  %vm647_vm10 = vcmask (!%p745_p5), 1041409  }
  0x1c   : > { %788 = vmatprep.mubr.bf16.mxu0 %v294_v6  ;;  %773 = vmatpush3.bf16.msra.mxu0 %v836_v7  ;;  %v842_v13 = vld [vmem:[%s255_s8 + $0x30] sm:$0xff]   ;;  %v843_v14 = vld [vmem:[%s255_s8 + $0x38] sm:$0xff]   ;;  %v844_v18 = vld [vmem:[%s273_s11] sm:$0xff]  }
  0x1d   : > { %774 = vmatprep.subr.bf16.mxu0 %v837_v8  ;;  %v961_v15 = vld [vmem:[#allocation2 + $0x10] sm:$0xff]  ;;  %v963_v16 = vld [vmem:[#allocation2 + $0x18] sm:$0xff]  ;;  %792 = vmatprep.subr.bf16.mxu1 %v844_v18  ;;  %v845_v19 = vld [vmem:[%s273_s11 + $0x8] sm:$0xff]  }
  0x1e   : > { %v295_v17 = vpack.c.bf16 %v963_v16, %v961_v15  ;;  %793 = vmatpush3.bf16.msra.mxu1 %v844_v18  ;;  %v846_v20 = vld [vmem:[%s273_s11 + $0x10] sm:$0xff]   ;;  %v847_v21 = vld [vmem:[%s273_s11 + $0x18] sm:$0xff]   ;;  %v848_v22 = vld [vmem:[%s273_s11 + $0x20] sm:$0xff]  }
  0x1f   : > { %794 = vmatprep.subr.bf16.mxu1 %v845_v19  ;;  %v849_v23 = vld [vmem:[%s273_s11 + $0x28] sm:$0xff]   ;;  %v850_v24 = vld [vmem:[%s273_s11 + $0x30] sm:$0xff]   ;;  %v851_v25 = vld [vmem:[%s273_s11 + $0x38] sm:$0xff]  }
  0x20   : > { %775 = vmatpush3.bf16.msra.mxu0 %v837_v8  ;;  %v727_v26 = vld [vmem:[%s290_s14] ss:$0 sm:$0xff] }
  0x21   : > { %776 = vmatprep.subr.bf16.mxu0 %v838_v9 }
  0x22   : > { %795 = vmatpush3.bf16.msra.mxu1 %v845_v19 }
  0x23   : > { %796 = vmatprep.subr.bf16.mxu1 %v846_v20 }
  0x24   : > { %777 = vmatpush3.bf16.msra.mxu0 %v838_v9 }
  0x25   : > { %778 = vmatprep.subr.bf16.mxu0 %v839_v10 }
  0x26   : > { %797 = vmatpush3.bf16.msra.mxu1 %v846_v20 }
  0x27   : > { %798 = vmatprep.subr.bf16.mxu1 %v847_v21 }
  0x28   : > { %779 = vmatpush3.bf16.msra.mxu0 %v839_v10 }
  0x29   : > { %780 = vmatprep.subr.bf16.mxu0 %v840_v11 }
  0x2a   : > { %799 = vmatpush3.bf16.msra.mxu1 %v847_v21 }
  0x2b   : > { %800 = vmatprep.subr.bf16.mxu1 %v848_v22 }
  0x2c   : > { %781 = vmatpush3.bf16.msra.mxu0 %v840_v11  ;;  %v540_v11 = vlaneseq }
  0x2d   : > { %782 = vmatprep.subr.bf16.mxu0 %v841_v12 }
  0x2e   : > { %801 = vmatpush3.bf16.msra.mxu1 %v848_v22 }
  0x2f   : > { %802 = vmatprep.subr.bf16.mxu1 %v849_v23 }
  0x30   : > { %783 = vmatpush3.bf16.msra.mxu0 %v841_v12  ;;  %v541_v12 = vand.u32 127, %v540_v11 }
  0x31   : > { %784 = vmatprep.subr.bf16.mxu0 %v842_v13 }
  0x32   : > { %803 = vmatpush3.bf16.msra.mxu1 %v849_v23  ;;  %vm561_vm1 = vcmp.ge.s32.totalorder %v541_v12, 32  ;;  %vm562_vm2 = vcmp.lt.s32.totalorder %v541_v12, 64  ;;  %vm583_vm4 = vcmp.ge.s32.totalorder %v541_v12, 64  ;;  %vm584_vm6 = vcmp.lt.s32.totalorder %v541_v12, 96 }
  0x33   : > { %804 = vmatprep.subr.bf16.mxu1 %v850_v24  ;;  %vm605_vm7 = vcmp.ge.s32.totalorder %v541_v12, 96  ;;  %vm982_vm8 = vmand %vm561_vm1, %vm562_vm2 }
  0x34   : > { %785 = vmatpush3.bf16.msra.mxu0 %v842_v13  ;;  %v736_v13 = vld [vmem:[%s292_s17] ss:$0 sm:$0xff]  ;;  %vm987_vm9 = vmand %vm583_vm4, %vm584_vm6 }
  0x35   : > { %786 = vmatprep.subr.bf16.mxu0 %v843_v14 }
  0x36   : > { %805 = vmatpush3.bf16.msra.mxu1 %v850_v24 }
  0x37   : > { %806 = vmatprep.subr.bf16.mxu1 %v851_v25 }
  0x38   : > { %787 = vmatpush3.bf16.msra.mxu0 %v843_v14 }
  0x3a   : > { %807 = vmatpush3.bf16.msra.mxu1 %v851_v25 }
  0x3b   : > { %789 = vmatmul.mubr.bf16.vlgmr.msra.gmra.mrb[0].mxu0 %v295_v17 }
 0x10e   : > { %v790_v27 = vpop.f32.mrb[0].mxu0 }
 0x10f   : > { %v393_v28 = vadd.f32 %v790_v27, %v727_v26  ;;  %v384_v29 = vpop.f32.mrb[1].mxu0 }
 0x110   : > { %v385_v30 = vadd.f32 %v727_v26, %v384_v29  ;;  %v791_v31 = vpop.f32.mrb[2].mxu0 }
 0x111   : > { %v401_v32 = vmul.f32 %v393_v28, %v393_v28  ;;  %v396_v33 = vadd.f32 %v791_v31, %v727_v26  ;;  %v387_v34 = vpop.f32.mrb[3].mxu0 }
 0x112   : > { %v399_v35 = vmul.f32 %v385_v30, %v385_v30  ;;  %v388_v36 = vadd.f32 %v727_v26, %v387_v34 }
 0x113   : > { %v405_v37 = vmul.f32 %v401_v32, %v393_v28  ;;  %v402_v38 = vmul.f32 %v396_v33, %v396_v33 }
 0x114   : > { %v403_v39 = vmul.f32 %v399_v35, %v385_v30  ;;  %v400_v40 = vmul.f32 %v388_v36, %v388_v36 }
 0x115   : > { %v409_v41 = vmul.f32 0.044715, %v405_v37  ;;  %v406_v42 = vmul.f32 %v402_v38, %v396_v33 }
 0x116   : > { %v407_v43 = vmul.f32 0.044715, %v403_v39  ;;  %v404_v44 = vmul.f32 %v400_v40, %v388_v36 }
 0x117   : > { %v413_v45 = vadd.f32 %v409_v41, %v393_v28  ;;  %v410_v46 = vmul.f32 0.044715, %v406_v42 }
 0x118   : > { %v408_v47 = vmul.f32 0.044715, %v404_v44  ;;  %v411_v48 = vadd.f32 %v407_v43, %v385_v30 }
 0x119   : > { %v417_v49 = vmul.f32 0.7978846, %v413_v45  ;;  %v414_v50 = vadd.f32 %v410_v46, %v396_v33 }
 0x11a   : > { %v412_v51 = vadd.f32 %v408_v47, %v388_v36  ;;  %v415_v52 = vmul.f32 0.7978846, %v411_v48 }
 0x11b   : > { %852 = vtanh.f32 %v417_v49  ;;  %v418_v53 = vmul.f32 0.7978846, %v414_v50 }
 0x11c   : > { %v416_v54 = vmul.f32 0.7978846, %v412_v51  ;;  %854 = vtanh.f32 %v415_v52 }
 0x11d   : > { %856 = vtanh.f32 %v418_v53 }
 0x11e   : > { %858 = vtanh.f32 %v416_v54 }
 0x125   : > { %v853_v55 = vpop.eup %852 }
 0x126   : > { %v855_v56 = vpop.eup %854  ;;  %v425_v57 = vadd.f32 1.0, %v853_v55 }
 0x127   : > { %v857_v58 = vpop.eup %856  ;;  %v423_v59 = vadd.f32 1.0, %v855_v56 }
 0x128   : > { %v859_v60 = vpop.eup %858  ;;  %v426_v61 = vadd.f32 1.0, %v857_v58  ;;  %v429_v62 = vmul.f32 0.5, %v425_v57 }
 0x129   : > { %v424_v63 = vadd.f32 1.0, %v859_v60  ;;  %v427_v0 = vmul.f32 0.5, %v423_v59 }
 0x12a   : > { %v430_v1 = vmul.f32 0.5, %v426_v61  ;;  %v433_v3 = vmul.f32 %v429_v62, %v393_v28 }
 0x12b   : > { %v428_v2 = vmul.f32 0.5, %v424_v63  ;;  %v431_v7 = vmul.f32 %v427_v0, %v385_v30 }
 0x12c   : > { %v434_v6 = vmul.f32 %v430_v1, %v396_v33 }
 0x12d   : > { %v432_v8 = vmul.f32 %v428_v2, %v388_v36 }
 0x12e   : > { %v436_v9 = vpack.c.bf16 %v434_v6, %v433_v3 }
 0x12f   : > { %v435_v10 = vpack.c.bf16 %v432_v8, %v431_v7 }
 0x131   : > { %808 = vmatprep.mubr.bf16.mxu1 %v435_v10 }
 0x132   : > { %809 = vmatmul.mubr.bf16.vlgmr.msra.gmra.mrb[0].mxu1 %v436_v9 }
 0x205   : > { %v810_v14 = vpop.f32.mrb[0].mxu1 }
 0x206   : > { %v534_v17 = vadd.f32 %v810_v14, %v736_v13  ;;  %v525_v18 = vpop.f32.mrb[1].mxu1 }
 0x207   : > { %v526_v19 = vadd.f32 %v736_v13, %v525_v18  ;;  %v811_v20 = vpop.f32.mrb[2].mxu1 }
 0x208   : > { %v550_v21 = vrot.slane %v534_v17, 1  ;;  %v537_v22 = vadd.f32 %v811_v20, %v736_v13  ;;  %v528_v23 = vpop.f32.mrb[3].mxu1  ;;  %v572_v24 = vrot.slane %v534_v17, 2  ;;  %v594_v25 = vrot.slane %v534_v17, 4 }
 0x209   : > { %v547_v26 = vrot.slane %v526_v19, 1  ;;  %v529_v27 = vadd.f32 %v736_v13, %v528_v23  ;;  %v569_v28 = vrot.slane %v526_v19, 2  ;;  %v591_v33 = vrot.slane %v526_v19, 4 }
 0x20a   : > { %v551_v29 = vrot.slane %v537_v22, 1  ;;  %v573_v31 = vrot.slane %v537_v22, 2  ;;  %v595_v32 = vrot.slane %v537_v22, 4 }
 0x20b   : > { %v548_v35 = vrot.slane %v529_v27, 1  ;;  %v570_v36 = vrot.slane %v529_v27, 2  ;;  %v592_v37 = vrot.slane %v529_v27, 4 }
 0x20c   : > { %v552_v38 = vsel %vm546_vm0, %v550_v21, %v551_v29  ;;  %v560_v39 = vsel %vm546_vm0, %v551_v29, %v550_v21  ;;  %v574_v40 = vsel %vm568_vm3, %v572_v24, %v573_v31  ;;  %v582_v41 = vsel %vm568_vm3, %v573_v31, %v572_v24 }
 0x20d   : > { %v566_v42 = vsel %vm982_vm8, %v552_v38, %v534_v17  ;;  %v567_v43 = vsel %vm982_vm8, %v560_v39, %v537_v22  ;;  %v596_v44 = vsel %vm590_vm5, %v594_v25, %v595_v32  ;;  %v604_v45 = vsel %vm590_vm5, %v595_v32, %v594_v25 }
 0x20e   : > { %v588_v46 = vsel %vm987_vm9, %v574_v40, %v566_v42  ;;  %v589_v47 = vsel %vm987_vm9, %v582_v41, %v567_v43  ;;  %v549_v48 = vsel %vm546_vm0, %v547_v26, %v548_v35  ;;  %v559_v49 = vsel %vm546_vm0, %v548_v35, %v547_v26 }
 0x20f   : > { %v610_v50 = vsel %vm605_vm7, %v596_v44, %v588_v46  ;;  %v611_v51 = vsel %vm605_vm7, %v604_v45, %v589_v47  ;;  %v564_v52 = vsel %vm982_vm8, %v549_v48, %v526_v19  ;;  %v565_v53 = vsel %vm982_vm8, %v559_v49, %v529_v27  ;;  %623 = sbr.rel (%p745_p5) target bundleno = 559 (0x22f), region = 78 }
 0x210   : > { %v614_v54 = vadd.f32 %v610_v50, %v961_v15  ;;  %v615_v55 = vadd.f32 %v611_v51, %v963_v16  ;;  %v571_v56 = vsel %vm568_vm3, %v569_v28, %v570_v36  ;;  %v581_v57 = vsel %vm568_vm3, %v570_v36, %v569_v28 }
 0x211   : > { %v586_v58 = vsel %vm987_vm9, %v571_v56, %v564_v52  ;;  %v587_v59 = vsel %vm987_vm9, %v581_v57, %v565_v53  ;;  %v593_v60 = vsel %vm590_vm5, %v591_v33, %v592_v37  ;;  %v603_v61 = vsel %vm590_vm5, %v592_v37, %v591_v33 }
 0x212   : > { %618 = vst [vmem:[#allocation2 + $0x10] sm:$0xff] %v614_v54  ;;  %619 = vst [vmem:[#allocation2 + $0x18] sm:$0xff] %v615_v55  ;;  %v608_v15 = vsel %vm605_vm7, %v593_v60, %v586_v58  ;;  %v609_v16 = vsel %vm605_vm7, %v603_v61, %v587_v59 }
 0x213   : > { %v612_v62 = vadd.f32 %v608_v15, %v950_v4  ;;  %v613_v63 = vadd.f32 %v609_v16, %v952_v5 }
 0x215   : > { %616 = vst [vmem:[#allocation2] sm:$0xff] %v612_v62  ;;  %617 = vst [vmem:[#allocation2 + $0x8] sm:$0xff] %v613_v63 }
 0x219   : > { %v626_v2 = vld [vmem:[#allocation2 + $0x10] sm:$0xff]  ;;  %v627_v3 = vld [vmem:[#allocation2 + $0x18] sm:$0xff] }
 0x21a   : > { %v635_v7 = vadd.f32 %v627_v3, %v626_v2 }
 0x21c   : > { %v624_v0 = vld [vmem:[#allocation2] sm:$0xff]  ;;  %v625_v1 = vld [vmem:[#allocation2 + $0x8] sm:$0xff]  ;;  %v636_v9 = vrot.slane %v635_v7, 4 }
 0x21d   : > { %v628_v6 = vadd.f32 %v625_v1, %v624_v0 }
 0x21e   : > { %v637_v11 = vadd.f32 %v636_v9, %v635_v7 }
 0x21f   : > { %v629_v8 = vrot.slane %v628_v6, 4 }
 0x220   : > { %v638_v13 = vrot.slane %v637_v11, 2 }
 0x221   : > { %v630_v10 = vadd.f32 %v629_v8, %v628_v6 }
 0x222   : > { %v639_v14 = vadd.f32 %v638_v13, %v637_v11 }
 0x223   : > { %v631_v12 = vrot.slane %v630_v10, 2 }
 0x224   : > { %v640_v17 = vrot.slane %v639_v14, 1 }
 0x225   : > { %v632_v4 = vadd.f32 %v631_v12, %v630_v10 }
 0x226   : > { %v641_v19 = vadd.f32 %v640_v17, %v639_v14 }
 0x227   : > { %v633_v5 = vrot.slane %v632_v4, 1 }
 0x228   : > { %v644_v21 = vmul.f32 0.0625, %v641_v19 }
 0x229   : > { %v634_v18 = vadd.f32 %v633_v5, %v632_v4 }
 0x22b   : > { %v643_v20 = vmul.f32 0.0625, %v634_v18 }
 0x22d   : > { %v648_v22 = vsel %vm647_vm10, %v644_v21, %v643_v20 }
 0x22e   : > { %650 = vst [vmem:[%s1045_s5] sm:$0x3] %v648_v22 }
 0x22f PF: > { %s15_s20 = sadd.s32 1, %s884_s20   ;;  %s1050_s18 = smov %s880_s19 }
 0x230   : > { %p12_p6 = scmp.ge.s32.totalorder %s15_s20, 6   ;;  %s1051_s19 = smov %s1053_s21 }
 0x232   :  { %14 = sbr.rel (!%p12_p6) target bundleno = 2 (0x2), region = 118 }
 0x239   :  { %670 = vsyncmov [#allocation3] }
 0x23c   :  { %s671_s23 = vpop.sfrf %670 }
 0x23d   :  { %p749_p7 = scmp.ne.s32.totalorder %s671_s23, 0 }
 0x23f   :  { %675 = shalt.err (%p749_p7)  }

</bundles_post_ra>
